<compile_context>
chip_gen: v5e
topology: v5e:2x2
jax: 0.10.0
libtpu: 0.0.40
codegen_flags: <defaults>
</compile_context>

<pallas_src>
import jax
import jax.numpy as jnp
from jax.experimental import pallas as pl
from jax.experimental.pallas import tpu as pltpu


def _mult_inverse_kernel(x_ref, o_ref):
    # Elementwise reciprocal; exact semantics of torch.pow(x, -1).
    o_ref[...] = 1.0 / x_ref[...]


_WIDE_LANE = 1024               # wide lane-dense slab (multiple of 128)
_TARGET_BLOCK_BYTES = 1 << 20   # ~1 MiB per input block


def mult_inverse(x):
    """Computes x ** -1 elementwise, matching torch.pow(x, -1) (float dtypes)."""
    orig_shape = x.shape
    orig_dtype = x.dtype
    assert jnp.issubdtype(orig_dtype, jnp.floating), (
        "MultInverse Pallas kernel supports floating dtypes only")

    itemsize = jnp.dtype(orig_dtype).itemsize
    flat = x.reshape(-1)
    n = flat.shape[0]

    # Pick the widest lane dim (multiple of 128) that divides n exactly so the
    # hot path stays copy-free (no concat-pad, no un-pad slice).
    lane = None
    for cand in (_WIDE_LANE, 512, 256, 128):
        if n % cand == 0:
            lane = cand
            break

    padded = False
    if lane is None:
        # Ragged fallback: pad tail to a multiple of 128 with ones (1/1 == 1).
        lane = 128
        pad = (-n) % lane
        flat = jnp.concatenate([flat, jnp.ones((pad,), dtype=orig_dtype)])
        padded = True

    rows = flat.shape[0] // lane
    x2d = flat.reshape(rows, lane)

    # Row-tile so each block is ~1 MiB (multiple of 8 rows); ~4 MiB total with
    # double-buffered in + out, well under scoped VMEM on v5e/v6e/v7x.
    tr = max(8, (_TARGET_BLOCK_BYTES // (lane * itemsize)) // 8 * 8)
    if tr >= rows:
        tr = rows  # single full-extent block (valid even if rows % 8 != 0)
    num_blocks = pl.cdiv(rows, tr)

    out2d = pl.pallas_call(
        _mult_inverse_kernel,
        out_shape=jax.ShapeDtypeStruct((rows, lane), orig_dtype),
        grid_spec=pltpu.PrefetchScalarGridSpec(
            num_scalar_prefetch=0,
            grid=(num_blocks,),
            in_specs=[pl.BlockSpec((tr, lane), lambda i: (i, 0))],
            out_specs=pl.BlockSpec((tr, lane), lambda i: (i, 0)),
        ),
        compiler_params=pltpu.CompilerParams(
            dimension_semantics=("parallel",),
        ),
        cost_estimate=pl.CostEstimate(
            flops=0,
            transcendentals=rows * lane,
            bytes_accessed=2 * rows * lane * itemsize,
        ),
    )(x2d)

    out = out2d.reshape(-1)
    if padded:
        out = out[:n]
    return out.reshape(orig_shape)


if __name__ == "__main__":
    key = jax.random.PRNGKey(0)
    # NCHW input, small shapes (2*4*16*16 = 2048 elements -> copy-free path).
    x = jax.random.normal(key, (2, 4, 16, 16), dtype=jnp.float32)
    y = mult_inverse(x)
    y = jax.block_until_ready(y)

    # Correctness check against plain JAX reference.
    ref = jnp.power(x, -1)
    assert y.shape == x.shape and y.dtype == x.dtype
    assert jnp.allclose(y, ref, rtol=1e-6, atol=1e-6)
    print("KERNEL_OK")
</pallas_src>

<mosaic_0001>
module attributes {stable_mosaic.version = 11 : i64} {
  func.func @_mult_inverse_kernel(%arg0: i32, %arg1: memref<2x1024xf32, #tpu.memory_space<vmem>>, %arg2: memref<2x1024xf32, #tpu.memory_space<vmem>>) attributes {dimension_semantics = [#tpu.dimension_semantics<parallel>], iteration_bounds = array<i64: 1>, scalar_prefetch = 0 : i64, scratch_operands = 0 : i64, tpu.core_type = #tpu.core_type<tc>, window_params = [{transform_indices = @transform_0, window_bounds = array<i64: 2, 1024>}, {transform_indices = @transform_1, window_bounds = array<i64: 2, 1024>}]} {
    %c0 = arith.constant 0 : index
    %c0_0 = arith.constant 0 : index
    %0 = vector.load %arg1[%c0, %c0_0] : memref<2x1024xf32, #tpu.memory_space<vmem>>, vector<2x1024xf32>
    %cst = arith.constant 1.000000e+00 : f32
    %1 = vector.broadcast %cst : f32 to vector<2x1024xf32>
    %2 = arith.divf %1, %0 : vector<2x1024xf32>
    %c0_1 = arith.constant 0 : index
    %c0_2 = arith.constant 0 : index
    %3 = vector.load %arg2[%c0_1, %c0_2] : memref<2x1024xf32, #tpu.memory_space<vmem>>, vector<2x1024xf32>
    tpu.vector_store %arg2[%c0_1, %c0_2], %2 {strides = array<i32>} : memref<2x1024xf32, #tpu.memory_space<vmem>>, vector<2x1024xf32>,
    return
  }
  func.func @transform_0(%arg0: i32) -> (i32, i32) {
    %c0_i32 = arith.constant 0 : i32
    %c0_i32_0 = arith.constant 0 : i32
    return %arg0, %c0_i32 : i32, i32
  }
  func.func @transform_1(%arg0: i32) -> (i32, i32) {
    %c0_i32 = arith.constant 0 : i32
    %c0_i32_0 = arith.constant 0 : i32
    return %arg0, %c0_i32 : i32, i32
  }
}

</mosaic_0001>

<bundles_post_ra>
// kernel: tpu_custom_call.1
= control target key start
LH: loop header
LB: loop body
LE: loop exit
PB: predicated region body
PF: predicated region fallthrough
CT: control target
= control target key end

     0   :  { %6 = vsyncpa [#allocation3], 0  ;;  %s150_s0 = inlined_call_operand.hbm [shape: f32[2,1024], index: 0, kind: input, shape index: {}]   ;;  %s151_s1 = inlined_call_operand.hbm [shape: f32[2,1024], index: 1, kind: output, shape index: {}]  }
   0x1   :  { %7 = vsyncpa [#allocation4], 0  ;;  %s13_s8 = sshll.u32 %s150_s0, 4  ;;  %s132_s9 = smov [#allocation2]   ;;  %s14_s8 = int_to_ptr.hbm [resolvable:$true] %s13_s8 }
   0x2   :  { %s15_s10 = sshll.u32 %s132_s9, 4  ;;  %s16_s10 = int_to_ptr.vmem [resolvable:$true] %s15_s10 }
   0x3   :  { %18 = dma.hbm_to_vmem [thread:$0]  %s14_s8, 256, %s16_s10, [#allocation3]  }
   0x4   :  { %128 = dma.done.wait [#allocation3], 256  }
   0x5   :  { %129 = vsyncadd [#allocation3], 4294967040  ;;  %v23_v0 = vld [vmem:[#allocation2] sm:$0xff]  ;;  %v24_v1 = vld [vmem:[#allocation2 + $0x8] sm:$0xff]  ;;  %s133_s0 = smov [#allocation5]   ;;  %s64_s14 = sshll.u32 %s151_s1, 4  ;;  %s65_s14 = int_to_ptr.hbm [resolvable:$true] %s64_s14 }
   0x6   :  { %76 = vrcp.f32 %v23_v0  ;;  %vm30_vm0 = vweird.f32 %v23_v0  ;;  %v36_v5 = vand.u32 2147483648, %v23_v0  ;;  %v34_v8 = vand.u32 2147483647, %v23_v0  ;;  %s62_s11 = sshll.u32 %s133_s0, 4  ;;  %s63_s11 = int_to_ptr.vmem [resolvable:$true] %s62_s11 }
   0x7   :  { %78 = vrcp.f32 %v24_v1  ;;  %v51_v9 = vand.u32 2147483648, %v24_v1  ;;  %vm45_vm2 = vweird.f32 %v24_v1  ;;  %v49_v11 = vand.u32 2147483647, %v24_v1 }
   0x8   :  { %v37_v13 = vor.u32 1.1754944e-38, %v36_v5  ;;  %vm35_vm5 = vcmp.eq.f32.partialorder %v34_v8, 8.507059e+37 }
   0x9   :  { %v52_v16 = vor.u32 1.1754944e-38, %v51_v9  ;;  %vm50_vm7 = vcmp.eq.f32.partialorder %v49_v11, 8.507059e+37 }
   0xc   :  { %v77_v2 = vpop.eup %76 }
   0xd   :  { %v79_v3 = vpop.eup %78  ;;  %v26_v4 = vmul.f32 %v77_v2, %v23_v0  ;;  %vm31_vm1 = vweird.f32 %v77_v2 }
   0xe   :  { %v41_v6 = vmul.f32 %v79_v3, %v24_v1  ;;  %vm46_vm3 = vweird.f32 %v79_v3  ;;  %vm32_vm4 = vmor %vm30_vm0, %vm31_vm1 }
   0xf   :  { %v27_v7 = vsub.f32 1.0, %v26_v4  ;;  %vm47_vm6 = vmor %vm45_vm2, %vm46_vm3 }
  0x10   :  { %v42_v10 = vsub.f32 1.0, %v41_v6 }
  0x11   :  { %v28_v12 = vmul.f32 %v77_v2, %v27_v7 }
  0x12   :  { %v43_v14 = vmul.f32 %v79_v3, %v42_v10 }
  0x13   :  { %v29_v15 = vadd.f32 %v77_v2, %v28_v12 }
  0x14   :  { %v44_v17 = vadd.f32 %v79_v3, %v43_v14 }
  0x15   :  { %v33_v18 = vsel %vm32_vm4, %v77_v2, %v29_v15 }
  0x16   :  { %v38_v19 = vsel %vm35_vm5, %v37_v13, %v33_v18  ;;  %v48_v20 = vsel %vm47_vm6, %v79_v3, %v44_v17 }
  0x17   :  { %55 = vst [vmem:[#allocation5] sm:$0xff] %v38_v19  ;;  %v53_v21 = vsel %vm50_vm7, %v52_v16, %v48_v20 }
  0x18   :  { %56 = vst [vmem:[#allocation5 + $0x8] sm:$0xff] %v53_v21 }
  0x19   :  { %67 = dma.vmem_to_hbm [thread:$0]  %s63_s11, 256, %s65_s14, [#allocation4]  }
  0x1a   :  { %130 = dma.done.wait [#allocation4], 256  }
  0x1b   :  { %131 = vsyncadd [#allocation4], 4294967040 }
  0x1c   :  { %72 = vsyncpa [#allocation3], 1 }
  0x1d   :  { %73 = vsyncpa [#allocation4], 1 }

</bundles_post_ra>
